<compile_context>
chip_gen: v5e
topology: v5e:2x2
jax: 0.10.0
libtpu: 0.0.40
codegen_flags: <defaults>
</compile_context>

<pallas_src>
import functools

import jax
import jax.numpy as jnp
import numpy as np
from jax.experimental import pallas as pl
from jax.experimental.pallas import tpu as pltpu

V_THRESHOLD = 1.0
BN_EPS = 1e-5
LANE = 128
_TM_MAX = 256                    # rows of the im2col matrix per tile (sublane dim)
_TK_MAX = 512                    # reduction (K) tile
_VMEM_LIMIT = 32 * 1024 * 1024   # safe on v5e/v6e/v7x


def _round_up(x, m):
    return (x + m - 1) // m * m


def _pad2d(a, rows, cols):
    return jnp.pad(a, ((0, rows - a.shape[0]), (0, cols - a.shape[1])))


def _tiles(M, K):
    """Pick (tm, M_pad, tk, K_pad) so blocks are (8,128)-aligned and divide the padded array."""
    m8 = _round_up(max(M, 8), 8)
    tm = min(_TM_MAX, m8)
    M_pad = _round_up(M, tm)
    k128 = _round_up(K, LANE)
    tk = min(_TK_MAX, k128)
    K_pad = _round_up(k128, tk)
    return tm, M_pad, tk, K_pad


# ----------------------------- Pallas kernels -----------------------------

def _conv_bn_spike_kernel(p_ref, w_ref, s_ref, b_ref, o_ref, acc_ref, *, v_th):
    """conv-as-matmul (K-tiled) -> folded BN -> IF spike (finalize only)."""
    k = pl.program_id(1)

    @pl.when(k == 0)
    def _():
        acc_ref[...] = jnp.zeros_like(acc_ref)

    acc_ref[...] += jnp.dot(p_ref[...], w_ref[...], preferred_element_type=jnp.float32)

    @pl.when(k == pl.num_programs(1) - 1)
    def _():
        y = acc_ref[...] * s_ref[...] + b_ref[...]          # BN once per output tile (f32)
        o_ref[...] = (y >= v_th).astype(o_ref.dtype)        # compare in f32; spike 0/1


def _conv1_downsample_fused_kernel(p_ref, w1_ref, s1_ref, b1_ref,
                                   wd_ref, sd_ref, bd_ref,
                                   o1_ref, osc_ref, acc1_ref, accd_ref, *, v_th):
    """Fused: conv1(3x3)+BN+IF spike AND downsample conv1x1+BN, sharing the same patches tile."""
    k = pl.program_id(1)

    @pl.when(k == 0)
    def _():
        acc1_ref[...] = jnp.zeros_like(acc1_ref)
        accd_ref[...] = jnp.zeros_like(accd_ref)

    p = p_ref[...]
    acc1_ref[...] += jnp.dot(p, w1_ref[...], preferred_element_type=jnp.float32)
    accd_ref[...] += jnp.dot(p, wd_ref[...], preferred_element_type=jnp.float32)

    @pl.when(k == pl.num_programs(1) - 1)
    def _():
        y1 = acc1_ref[...] * s1_ref[...] + b1_ref[...]
        o1_ref[...] = (y1 >= v_th).astype(o1_ref.dtype)      # bf16 spikes (lossless 0/1)
        osc_ref[...] = (accd_ref[...] * sd_ref[...] + bd_ref[...]).astype(osc_ref.dtype)


def _conv_bn_add_spike_kernel(p_ref, w_ref, s_ref, b_ref, sc_ref, o_ref, acc_ref, *, v_th):
    """conv2-as-matmul (K-tiled) -> folded BN -> + shortcut -> IF spike (finalize only)."""
    k = pl.program_id(1)

    @pl.when(k == 0)
    def _():
        acc_ref[...] = jnp.zeros_like(acc_ref)

    acc_ref[...] += jnp.dot(p_ref[...], w_ref[...], preferred_element_type=jnp.float32)

    @pl.when(k == pl.num_programs(1) - 1)
    def _():
        y = acc_ref[...] * s_ref[...] + b_ref[...] + sc_ref[...].astype(jnp.float32)
        o_ref[...] = (y >= v_th).astype(o_ref.dtype)


# ----------------------------- pallas_call wrappers -----------------------------

def _compiler_params():
    return pltpu.CompilerParams(
        dimension_semantics=("parallel", "arbitrary"),
        vmem_limit_bytes=_VMEM_LIMIT)


def conv1_pallas(patches, w1, s1, b1):
    """conv3x3 -> BN -> IF.  patches (M,K) f32/bf16, w1 (K,C1).  Returns ((M_pad,C1p) bf16, C1p)."""
    M, K = patches.shape
    C1 = w1.shape[1]
    tm, M_pad, tk, K_pad = _tiles(M, K)
    C1p = _round_up(C1, LANE)

    p = _pad2d(patches, M_pad, K_pad).astype(jnp.bfloat16)
    w = _pad2d(w1, K_pad, C1p).astype(jnp.bfloat16)
    s = _pad2d(s1, 1, C1p)
    b = _pad2d(b1, 1, C1p)

    out = pl.pallas_call(
        functools.partial(_conv_bn_spike_kernel, v_th=V_THRESHOLD),
        out_shape=jax.ShapeDtypeStruct((M_pad, C1p), jnp.bfloat16),
        grid_spec=pltpu.PrefetchScalarGridSpec(
            num_scalar_prefetch=0,
            grid=(M_pad // tm, K_pad // tk),
            in_specs=[
                pl.BlockSpec((tm, tk), lambda m, k: (m, k)),
                pl.BlockSpec((tk, C1p), lambda m, k: (k, 0)),
                pl.BlockSpec((1, C1p), lambda m, k: (0, 0)),
                pl.BlockSpec((1, C1p), lambda m, k: (0, 0)),
            ],
            out_specs=pl.BlockSpec((tm, C1p), lambda m, k: (m, 0)),
            scratch_shapes=[pltpu.VMEM((tm, C1p), jnp.float32)],
        ),
        compiler_params=_compiler_params(),
    )(p, w, s, b)
    return out, C1p


def conv1_downsample_pallas(patches, w1, s1, b1, wd_emb, sd, bd):
    """Fused conv1+BN+IF and 1x1-downsample+BN over the same patches stream."""
    M, K = patches.shape
    C1 = w1.shape[1]
    Cd = wd_emb.shape[1]
    tm, M_pad, tk, K_pad = _tiles(M, K)
    C1p = _round_up(C1, LANE)
    Cdp = _round_up(Cd, LANE)

    p = _pad2d(patches, M_pad, K_pad).astype(jnp.bfloat16)
    w1p = _pad2d(w1, K_pad, C1p).astype(jnp.bfloat16)
    wdp = _pad2d(wd_emb, K_pad, Cdp).astype(jnp.bfloat16)
    s1p = _pad2d(s1, 1, C1p)
    b1p = _pad2d(b1, 1, C1p)
    sdp = _pad2d(sd, 1, Cdp)
    bdp = _pad2d(bd, 1, Cdp)

    out1, sc = pl.pallas_call(
        functools.partial(_conv1_downsample_fused_kernel, v_th=V_THRESHOLD),
        out_shape=(jax.ShapeDtypeStruct((M_pad, C1p), jnp.bfloat16),
                   jax.ShapeDtypeStruct((M_pad, Cdp), jnp.float32)),
        grid_spec=pltpu.PrefetchScalarGridSpec(
            num_scalar_prefetch=0,
            grid=(M_pad // tm, K_pad // tk),
            in_specs=[
                pl.BlockSpec((tm, tk), lambda m, k: (m, k)),
                pl.BlockSpec((tk, C1p), lambda m, k: (k, 0)),
                pl.BlockSpec((1, C1p), lambda m, k: (0, 0)),
                pl.BlockSpec((1, C1p), lambda m, k: (0, 0)),
                pl.BlockSpec((tk, Cdp), lambda m, k: (k, 0)),
                pl.BlockSpec((1, Cdp), lambda m, k: (0, 0)),
                pl.BlockSpec((1, Cdp), lambda m, k: (0, 0)),
            ],
            out_specs=(pl.BlockSpec((tm, C1p), lambda m, k: (m, 0)),
                       pl.BlockSpec((tm, Cdp), lambda m, k: (m, 0))),
            scratch_shapes=[pltpu.VMEM((tm, C1p), jnp.float32),
                            pltpu.VMEM((tm, Cdp), jnp.float32)],
        ),
        compiler_params=_compiler_params(),
    )(p, w1p, s1p, b1p, wdp, sdp, bdp)
    return out1, sc, C1p, Cdp


def conv2_add_spike_pallas(patches, w2, s2, b2, shortcut, Cp):
    """conv3x3 -> BN -> + shortcut -> IF spike.  Returns (M_pad, Cp) f32 spikes."""
    M, K = patches.shape
    tm, M_pad, tk, K_pad = _tiles(M, K)

    p = _pad2d(patches, M_pad, K_pad).astype(jnp.bfloat16)
    w = _pad2d(w2, K_pad, Cp).astype(jnp.bfloat16)
    s = _pad2d(s2, 1, Cp)
    b = _pad2d(b2, 1, Cp)
    sc = _pad2d(shortcut, M_pad, Cp).astype(jnp.float32)

    out = pl.pallas_call(
        functools.partial(_conv_bn_add_spike_kernel, v_th=V_THRESHOLD),
        out_shape=jax.ShapeDtypeStruct((M_pad, Cp), jnp.float32),
        grid_spec=pltpu.PrefetchScalarGridSpec(
            num_scalar_prefetch=0,
            grid=(M_pad // tm, K_pad // tk),
            in_specs=[
                pl.BlockSpec((tm, tk), lambda m, k: (m, k)),
                pl.BlockSpec((tk, Cp), lambda m, k: (k, 0)),
                pl.BlockSpec((1, Cp), lambda m, k: (0, 0)),
                pl.BlockSpec((1, Cp), lambda m, k: (0, 0)),
                pl.BlockSpec((tm, Cp), lambda m, k: (m, 0)),   # shortcut tiled with out_spec
            ],
            out_specs=pl.BlockSpec((tm, Cp), lambda m, k: (m, 0)),
            scratch_shapes=[pltpu.VMEM((tm, Cp), jnp.float32)],
        ),
        compiler_params=_compiler_params(),
    )(p, w, s, b, sc)
    return out


# ----------------------------- plain-JAX glue -----------------------------

def im2col(x_nhwc, ksize, stride, padding):
    """Extract conv patches. Returns ((N*Ho*Wo, k*k*C), (N, Ho, Wo))."""
    N, H, W, C = x_nhwc.shape
    xp = jnp.pad(x_nhwc, ((0, 0), (padding, padding), (padding, padding), (0, 0)))
    Ho = (H + 2 * padding - ksize) // stride + 1
    Wo = (W + 2 * padding - ksize) // stride + 1
    cols = []
    for dy in range(ksize):
        for dx in range(ksize):
            patch = xp[:, dy:dy + stride * (Ho - 1) + 1:stride,
                          dx:dx + stride * (Wo - 1) + 1:stride, :]
            cols.append(patch)
    patches = jnp.concatenate(cols, axis=-1)          # (N, Ho, Wo, k*k*C)
    return patches.reshape(N * Ho * Wo, ksize * ksize * C), (N, Ho, Wo)


def fold_bn(gamma, beta, mean, var):
    scale = gamma / jnp.sqrt(var + BN_EPS)
    bias = beta - mean * scale
    return scale.reshape(1, -1).astype(jnp.float32), bias.reshape(1, -1).astype(jnp.float32)


class BasicBlockPallas:
    """Mirrors BasicBlock(in_planes, planes, honey, index, stride)."""
    expansion = 1

    def __init__(self, key, in_planes, planes, honey, index, stride=1):
        mid = int(planes * honey[index] / 10)
        self.stride = stride
        self.in_planes, self.mid, self.planes = in_planes, mid, planes
        self.has_downsample = (stride != 1) or (in_planes != self.expansion * planes)

        ks = jax.random.split(key, 6)

        def conv_w(k, kh, kw, cin, cout):
            w = jax.random.normal(k, (kh, kw, cin, cout), jnp.float32) * 0.2
            return w.reshape(kh * kw * cin, cout)

        def bn_params(k, c):
            k1, k2, k3, k4 = jax.random.split(k, 4)
            gamma = 1.0 + 0.1 * jax.random.normal(k1, (c,), jnp.float32)
            beta = 0.1 * jax.random.normal(k2, (c,), jnp.float32)
            mean = 0.1 * jax.random.normal(k3, (c,), jnp.float32)
            var = jax.random.uniform(k4, (c,), jnp.float32, 0.5, 1.5)
            return fold_bn(gamma, beta, mean, var)

        self.w1 = conv_w(ks[0], 3, 3, in_planes, mid)
        self.s1, self.b1 = bn_params(ks[1], mid)
        self.w2 = conv_w(ks[2], 3, 3, mid, planes)
        self.s2, self.b2 = bn_params(ks[3], planes)
        if self.has_downsample:
            cout = self.expansion * planes
            self.wd = conv_w(ks[4], 1, 1, in_planes, cout)          # (Cin, Cout)
            self.sd, self.bd = bn_params(ks[5], cout)
            # Embed the 1x1 weight at the centre-tap rows (dy=dx=1) of the 3x3 im2col K axis,
            # so the downsample conv reuses the exact same patches tiles as conv1.
            wd_emb = jnp.zeros((9 * in_planes, cout), jnp.float32)
            self.wd_emb = wd_emb.at[4 * in_planes:5 * in_planes, :].set(self.wd)

    def __call__(self, x_nchw):
        x = jnp.transpose(x_nchw, (0, 2, 3, 1)).astype(jnp.float32)   # NCHW -> NHWC
        N, H, W, _ = x.shape
        Cp = _round_up(self.expansion * self.planes, LANE)

        # conv1 patches (also carry the downsample 1x1 patches at the centre tap)
        p1, (n, ho, wo) = im2col(x, 3, self.stride, 1)
        M = n * ho * wo

        if self.has_downsample:
            out1_p, sc_p, _, _ = conv1_downsample_pallas(
                p1, self.w1, self.s1, self.b1, self.wd_emb, self.sd, self.bd)
        else:
            out1_p, _ = conv1_pallas(p1, self.w1, self.s1, self.b1)
            # identity shortcut (stride == 1 and in_planes == planes)
            sc_p = x.reshape(N * H * W, self.in_planes)

        # slice off channel padding before re-expanding for conv2 (keeps K2 small)
        out1 = out1_p[:M, :self.mid].reshape(n, ho, wo, self.mid)     # bf16 spikes

        # conv2 (3x3, stride 1) + bn2 + shortcut add + IF neuron2  (fused Pallas kernel)
        p2, _ = im2col(out1, 3, 1, 1)
        out_p = conv2_add_spike_pallas(p2, self.w2, self.s2, self.b2, sc_p, Cp)
        out = out_p[:M, :self.planes].reshape(n, ho, wo, self.planes)
        return jnp.transpose(out, (0, 3, 1, 2))                       # NHWC -> NCHW

    # pure-JAX reference (same math: bf16 operands, f32 accumulation) for verification
    def reference(self, x_nchw):
        x = jnp.transpose(x_nchw, (0, 2, 3, 1)).astype(jnp.float32)

        def conv(inp, w_flat, kh, kw, cin, cout, stride, pad):
            w = w_flat.reshape(kh, kw, cin, cout).astype(jnp.bfloat16)
            return jax.lax.conv_general_dilated(
                inp.astype(jnp.bfloat16), w, (stride, stride), [(pad, pad), (pad, pad)],
                dimension_numbers=("NHWC", "HWIO", "NHWC"),
                preferred_element_type=jnp.float32)

        y = conv(x, self.w1, 3, 3, self.in_planes, self.mid, self.stride, 1)
        y = y * self.s1.reshape(1, 1, 1, -1) + self.b1.reshape(1, 1, 1, -1)
        spike1 = (y >= V_THRESHOLD).astype(jnp.float32)
        y2 = conv(spike1, self.w2, 3, 3, self.mid, self.planes, 1, 1)
        y2 = y2 * self.s2.reshape(1, 1, 1, -1) + self.b2.reshape(1, 1, 1, -1)
        if self.has_downsample:
            sc = conv(x, self.wd, 1, 1, self.in_planes, self.planes, self.stride, 0)
            sc = sc * self.sd.reshape(1, 1, 1, -1) + self.bd.reshape(1, 1, 1, -1)
        else:
            sc = x
        pre = y2 + sc
        out = (pre >= V_THRESHOLD).astype(jnp.float32)
        return (jnp.transpose(out, (0, 3, 1, 2)),
                jnp.transpose(pre, (0, 3, 1, 2)))


if __name__ == "__main__":
    key = jax.random.PRNGKey(0)
    k_param, k_x = jax.random.split(key)

    # BasicBlock(in_planes=4, planes=8, honey=[5], index=0, stride=2) -> mid channels = 4
    block = BasicBlockPallas(k_param, in_planes=4, planes=8, honey=[5], index=0, stride=2)

    x = jax.random.normal(k_x, (2, 4, 16, 16), jnp.float32)  # NCHW, as PyTorch

    fwd = jax.jit(block.__call__)
    out = jax.block_until_ready(fwd(x))
    assert out.shape == (2, 8, 8, 8), out.shape

    ref_spike, ref_pre = block.reference(x)
    ref_spike = np.asarray(jax.block_until_ready(ref_spike))
    ref_pre = np.asarray(ref_pre)
    out_np = np.asarray(out)

    mismatch = out_np != ref_spike
    if mismatch.any():
        # Only tolerate flips caused by bf16/accumulation-order bit noise exactly at the
        # IF threshold; anything else is a real error.
        max_dist = float(np.abs(ref_pre[mismatch] - V_THRESHOLD).max())
        assert max_dist < 1e-2, (int(mismatch.sum()), max_dist)
    print("KERNEL_OK")
</pallas_src>

<mosaic_0001>
module attributes {stable_mosaic.version = 11 : i64} {
  func.func @_conv1_downsample_fused_kernel(%arg0: i32, %arg1: i32, %arg2: memref<128x128xbf16, #tpu.memory_space<vmem>>, %arg3: memref<128x128xbf16, #tpu.memory_space<vmem>>, %arg4: memref<1x128xf32, #tpu.memory_space<vmem>>, %arg5: memref<1x128xf32, #tpu.memory_space<vmem>>, %arg6: memref<128x128xbf16, #tpu.memory_space<vmem>>, %arg7: memref<1x128xf32, #tpu.memory_space<vmem>>, %arg8: memref<1x128xf32, #tpu.memory_space<vmem>>, %arg9: memref<128x128xbf16, #tpu.memory_space<vmem>>, %arg10: memref<128x128xf32, #tpu.memory_space<vmem>>, %arg11: memref<128x128xf32, #tpu.memory_space<vmem>>, %arg12: memref<128x128xf32, #tpu.memory_space<vmem>>) attributes {dimension_semantics = [#tpu.dimension_semantics<parallel>, #tpu.dimension_semantics<arbitrary>], iteration_bounds = array<i64: 1, 1>, scalar_prefetch = 0 : i64, scratch_operands = 2 : i64, tpu.core_type = #tpu.core_type<tc>, window_params = [{transform_indices = @transform_0, window_bounds = array<i64: 128, 128>}, {transform_indices = @transform_1, window_bounds = array<i64: 128, 128>}, {pipeline_mode = #tpu.pipeline_mode<synchronous>, transform_indices = @transform_2, window_bounds = array<i64: 1, 128>}, {pipeline_mode = #tpu.pipeline_mode<synchronous>, transform_indices = @transform_3, window_bounds = array<i64: 1, 128>}, {transform_indices = @transform_4, window_bounds = array<i64: 128, 128>}, {pipeline_mode = #tpu.pipeline_mode<synchronous>, transform_indices = @transform_5, window_bounds = array<i64: 1, 128>}, {pipeline_mode = #tpu.pipeline_mode<synchronous>, transform_indices = @transform_6, window_bounds = array<i64: 1, 128>}, {transform_indices = @transform_7, window_bounds = array<i64: 128, 128>}, {transform_indices = @transform_8, window_bounds = array<i64: 128, 128>}]} {
    %c0_i32 = arith.constant 0 : i32
    %0 = arith.cmpi eq, %arg1, %c0_i32 : i32
    %1 = arith.extui %0 : i1 to i32
    %c0_i32_0 = arith.constant 0 : i32
    %2 = arith.cmpi ne, %1, %c0_i32_0 : i32
    scf.if %2 {
      %cst_17 = arith.constant 0.000000e+00 : f32
      %17 = vector.broadcast %cst_17 : f32 to vector<128x128xf32>
      %c0_18 = arith.constant 0 : index
      %c0_19 = arith.constant 0 : index
      %18 = vector.load %arg11[%c0_18, %c0_19] : memref<128x128xf32, #tpu.memory_space<vmem>>, vector<128x128xf32>
      tpu.vector_store %arg11[%c0_18, %c0_19], %17 {strides = array<i32>} : memref<128x128xf32, #tpu.memory_space<vmem>>, vector<128x128xf32>,
      %cst_20 = arith.constant 0.000000e+00 : f32
      %19 = vector.broadcast %cst_20 : f32 to vector<128x128xf32>
      %c0_21 = arith.constant 0 : index
      %c0_22 = arith.constant 0 : index
      %20 = vector.load %arg12[%c0_21, %c0_22] : memref<128x128xf32, #tpu.memory_space<vmem>>, vector<128x128xf32>
      tpu.vector_store %arg12[%c0_21, %c0_22], %19 {strides = array<i32>} : memref<128x128xf32, #tpu.memory_space<vmem>>, vector<128x128xf32>,
    } else {
    }
    %c0 = arith.constant 0 : index
    %c0_1 = arith.constant 0 : index
    %3 = vector.load %arg2[%c0, %c0_1] : memref<128x128xbf16, #tpu.memory_space<vmem>>, vector<128x128xbf16>
    %c0_2 = arith.constant 0 : index
    %c0_3 = arith.constant 0 : index
    %4 = vector.load %arg11[%c0_2, %c0_3] : memref<128x128xf32, #tpu.memory_space<vmem>>, vector<128x128xf32>
    %c0_4 = arith.constant 0 : index
    %c0_5 = arith.constant 0 : index
    %5 = vector.load %arg3[%c0_4, %c0_5] : memref<128x128xbf16, #tpu.memory_space<vmem>>, vector<128x128xbf16>
    %cst = arith.constant dense<0.000000e+00> : vector<128x128xf32>
    %6 = tpu.matmul %3, %5, %cst {dimension_numbers = #tpu.dot_dimension_numbers<[1], [0], [0], [1], [0, 0, 1, 1], [], []>} : vector<128x128xbf16>, vector<128x128xbf16>, vector<128x128xf32> -> vector<128x128xf32>
    %7 = arith.addf %4, %6 : vector<128x128xf32>
    %c0_6 = arith.constant 0 : index
    %c0_7 = arith.constant 0 : index
    %8 = vector.load %arg11[%c0_6, %c0_7] : memref<128x128xf32, #tpu.memory_space<vmem>>, vector<128x128xf32>
    tpu.vector_store %arg11[%c0_6, %c0_7], %7 {strides = array<i32>} : memref<128x128xf32, #tpu.memory_space<vmem>>, vector<128x128xf32>,
    %c0_8 = arith.constant 0 : index
    %c0_9 = arith.constant 0 : index
    %9 = vector.load %arg12[%c0_8, %c0_9] : memref<128x128xf32, #tpu.memory_space<vmem>>, vector<128x128xf32>
    %c0_10 = arith.constant 0 : index
    %c0_11 = arith.constant 0 : index
    %10 = vector.load %arg6[%c0_10, %c0_11] : memref<128x128xbf16, #tpu.memory_space<vmem>>, vector<128x128xbf16>
    %cst_12 = arith.constant dense<0.000000e+00> : vector<128x128xf32>
    %11 = tpu.matmul %3, %10, %cst_12 {dimension_numbers = #tpu.dot_dimension_numbers<[1], [0], [0], [1], [0, 0, 1, 1], [], []>} : vector<128x128xbf16>, vector<128x128xbf16>, vector<128x128xf32> -> vector<128x128xf32>
    %12 = arith.addf %9, %11 : vector<128x128xf32>
    %c0_13 = arith.constant 0 : index
    %c0_14 = arith.constant 0 : index
    %13 = vector.load %arg12[%c0_13, %c0_14] : memref<128x128xf32, #tpu.memory_space<vmem>>, vector<128x128xf32>
    tpu.vector_store %arg12[%c0_13, %c0_14], %12 {strides = array<i32>} : memref<128x128xf32, #tpu.memory_space<vmem>>, vector<128x128xf32>,
    %c0_i32_15 = arith.constant 0 : i32
    %14 = arith.cmpi eq, %arg1, %c0_i32_15 : i32
    %15 = arith.extui %14 : i1 to i32
    %c0_i32_16 = arith.constant 0 : i32
    %16 = arith.cmpi ne, %15, %c0_i32_16 : i32
    scf.if %16 {
      %c0_17 = arith.constant 0 : index
      %c0_18 = arith.constant 0 : index
      %17 = vector.load %arg11[%c0_17, %c0_18] : memref<128x128xf32, #tpu.memory_space<vmem>>, vector<128x128xf32>
      %c0_19 = arith.constant 0 : index
      %c0_20 = arith.constant 0 : index
      %18 = vector.load %arg4[%c0_19, %c0_20] : memref<1x128xf32, #tpu.memory_space<vmem>>, vector<1x128xf32>
      %19 = vector.broadcast %18 : vector<1x128xf32> to vector<128x128xf32>
      %20 = arith.mulf %17, %19 : vector<128x128xf32>
      %c0_21 = arith.constant 0 : index
      %c0_22 = arith.constant 0 : index
      %21 = vector.load %arg5[%c0_21, %c0_22] : memref<1x128xf32, #tpu.memory_space<vmem>>, vector<1x128xf32>
      %22 = vector.broadcast %21 : vector<1x128xf32> to vector<128x128xf32>
      %23 = arith.addf %20, %22 : vector<128x128xf32>
      %cst_23 = arith.constant 1.000000e+00 : f32
      %24 = vector.broadcast %cst_23 : f32 to vector<128x128xf32>
      %25 = arith.cmpf oge, %23, %24 : vector<128x128xf32>
      %26 = arith.extui %25 : vector<128x128xi1> to vector<128x128xi32>
      %27 = arith.sitofp %26 : vector<128x128xi32> to vector<128x128xf32>
      %28 = arith.truncf %27 : vector<128x128xf32> to vector<128x128xbf16>
      %c0_24 = arith.constant 0 : index
      %c0_25 = arith.constant 0 : index
      %29 = vector.load %arg9[%c0_24, %c0_25] : memref<128x128xbf16, #tpu.memory_space<vmem>>, vector<128x128xbf16>
      tpu.vector_store %arg9[%c0_24, %c0_25], %28 {strides = array<i32>} : memref<128x128xbf16, #tpu.memory_space<vmem>>, vector<128x128xbf16>,
      %c0_26 = arith.constant 0 : index
      %c0_27 = arith.constant 0 : index
      %30 = vector.load %arg12[%c0_26, %c0_27] : memref<128x128xf32, #tpu.memory_space<vmem>>, vector<128x128xf32>
      %c0_28 = arith.constant 0 : index
      %c0_29 = arith.constant 0 : index
      %31 = vector.load %arg7[%c0_28, %c0_29] : memref<1x128xf32, #tpu.memory_space<vmem>>, vector<1x128xf32>
      %32 = vector.broadcast %31 : vector<1x128xf32> to vector<128x128xf32>
      %33 = arith.mulf %30, %32 : vector<128x128xf32>
      %c0_30 = arith.constant 0 : index
      %c0_31 = arith.constant 0 : index
      %34 = vector.load %arg8[%c0_30, %c0_31] : memref<1x128xf32, #tpu.memory_space<vmem>>, vector<1x128xf32>
      %35 = vector.broadcast %34 : vector<1x128xf32> to vector<128x128xf32>
      %36 = arith.addf %33, %35 : vector<128x128xf32>
      %c0_32 = arith.constant 0 : index
      %c0_33 = arith.constant 0 : index
      %37 = vector.load %arg10[%c0_32, %c0_33] : memref<128x128xf32, #tpu.memory_space<vmem>>, vector<128x128xf32>
      tpu.vector_store %arg10[%c0_32, %c0_33], %36 {strides = array<i32>} : memref<128x128xf32, #tpu.memory_space<vmem>>, vector<128x128xf32>,
    } else {
    }
    return
  }
  func.func @transform_0(%arg0: i32, %arg1: i32) -> (i32, i32) {
    %c0_i32 = arith.constant 0 : i32
    return %arg0, %arg1 : i32, i32
  }
  func.func @transform_1(%arg0: i32, %arg1: i32) -> (i32, i32) {
    %c0_i32 = arith.constant 0 : i32
    %c0_i32_0 = arith.constant 0 : i32
    return %arg1, %c0_i32 : i32, i32
  }
  func.func @transform_2(%arg0: i32, %arg1: i32) -> (i32, i32) {
    %c0_i32 = arith.constant 0 : i32
    %c0_i32_0 = arith.constant 0 : i32
    %c0_i32_1 = arith.constant 0 : i32
    return %c0_i32, %c0_i32_0 : i32, i32
  }
  func.func @transform_3(%arg0: i32, %arg1: i32) -> (i32, i32) {
    %c0_i32 = arith.constant 0 : i32
    %c0_i32_0 = arith.constant 0 : i32
    %c0_i32_1 = arith.constant 0 : i32
    return %c0_i32, %c0_i32_0 : i32, i32
  }
  func.func @transform_4(%arg0: i32, %arg1: i32) -> (i32, i32) {
    %c0_i32 = arith.constant 0 : i32
    %c0_i32_0 = arith.constant 0 : i32
    return %arg1, %c0_i32 : i32, i32
  }
  func.func @transform_5(%arg0: i32, %arg1: i32) -> (i32, i32) {
    %c0_i32 = arith.constant 0 : i32
    %c0_i32_0 = arith.constant 0 : i32
    %c0_i32_1 = arith.constant 0 : i32
    return %c0_i32, %c0_i32_0 : i32, i32
  }
  func.func @transform_6(%arg0: i32, %arg1: i32) -> (i32, i32) {
    %c0_i32 = arith.constant 0 : i32
    %c0_i32_0 = arith.constant 0 : i32
    %c0_i32_1 = arith.constant 0 : i32
    return %c0_i32, %c0_i32_0 : i32, i32
  }
  func.func @transform_7(%arg0: i32, %arg1: i32) -> (i32, i32) {
    %c0_i32 = arith.constant 0 : i32
    %c0_i32_0 = arith.constant 0 : i32
    return %arg0, %c0_i32 : i32, i32
  }
  func.func @transform_8(%arg0: i32, %arg1: i32) -> (i32, i32) {
    %c0_i32 = arith.constant 0 : i32
    %c0_i32_0 = arith.constant 0 : i32
    return %arg0, %c0_i32 : i32, i32
  }
}

module attributes {stable_mosaic.version = 11 : i64} {
  func.func @_conv_bn_add_spike_kernel(%arg0: i32, %arg1: i32, %arg2: memref<128x128xbf16, #tpu.memory_space<vmem>>, %arg3: memref<128x128xbf16, #tpu.memory_space<vmem>>, %arg4: memref<1x128xf32, #tpu.memory_space<vmem>>, %arg5: memref<1x128xf32, #tpu.memory_space<vmem>>, %arg6: memref<128x128xf32, #tpu.memory_space<vmem>>, %arg7: memref<128x128xf32, #tpu.memory_space<vmem>>, %arg8: memref<128x128xf32, #tpu.memory_space<vmem>>) attributes {dimension_semantics = [#tpu.dimension_semantics<parallel>, #tpu.dimension_semantics<arbitrary>], iteration_bounds = array<i64: 1, 1>, scalar_prefetch = 0 : i64, scratch_operands = 1 : i64, tpu.core_type = #tpu.core_type<tc>, window_params = [{transform_indices = @transform_0, window_bounds = array<i64: 128, 128>}, {transform_indices = @transform_1, window_bounds = array<i64: 128, 128>}, {pipeline_mode = #tpu.pipeline_mode<synchronous>, transform_indices = @transform_2, window_bounds = array<i64: 1, 128>}, {pipeline_mode = #tpu.pipeline_mode<synchronous>, transform_indices = @transform_3, window_bounds = array<i64: 1, 128>}, {transform_indices = @transform_4, window_bounds = array<i64: 128, 128>}, {transform_indices = @transform_5, window_bounds = array<i64: 128, 128>}]} {
    %c0_i32 = arith.constant 0 : i32
    %0 = arith.cmpi eq, %arg1, %c0_i32 : i32
    %1 = arith.extui %0 : i1 to i32
    %c0_i32_0 = arith.constant 0 : i32
    %2 = arith.cmpi ne, %1, %c0_i32_0 : i32
    scf.if %2 {
      %cst_10 = arith.constant 0.000000e+00 : f32
      %12 = vector.broadcast %cst_10 : f32 to vector<128x128xf32>
      %c0_11 = arith.constant 0 : index
      %c0_12 = arith.constant 0 : index
      %13 = vector.load %arg8[%c0_11, %c0_12] : memref<128x128xf32, #tpu.memory_space<vmem>>, vector<128x128xf32>
      tpu.vector_store %arg8[%c0_11, %c0_12], %12 {strides = array<i32>} : memref<128x128xf32, #tpu.memory_space<vmem>>, vector<128x128xf32>,
    } else {
    }
    %c0 = arith.constant 0 : index
    %c0_1 = arith.constant 0 : index
    %3 = vector.load %arg8[%c0, %c0_1] : memref<128x128xf32, #tpu.memory_space<vmem>>, vector<128x128xf32>
    %c0_2 = arith.constant 0 : index
    %c0_3 = arith.constant 0 : index
    %4 = vector.load %arg2[%c0_2, %c0_3] : memref<128x128xbf16, #tpu.memory_space<vmem>>, vector<128x128xbf16>
    %c0_4 = arith.constant 0 : index
    %c0_5 = arith.constant 0 : index
    %5 = vector.load %arg3[%c0_4, %c0_5] : memref<128x128xbf16, #tpu.memory_space<vmem>>, vector<128x128xbf16>
    %cst = arith.constant dense<0.000000e+00> : vector<128x128xf32>
    %6 = tpu.matmul %4, %5, %cst {dimension_numbers = #tpu.dot_dimension_numbers<[1], [0], [0], [1], [0, 0, 1, 1], [], []>} : vector<128x128xbf16>, vector<128x128xbf16>, vector<128x128xf32> -> vector<128x128xf32>
    %7 = arith.addf %3, %6 : vector<128x128xf32>
    %c0_6 = arith.constant 0 : index
    %c0_7 = arith.constant 0 : index
    %8 = vector.load %arg8[%c0_6, %c0_7] : memref<128x128xf32, #tpu.memory_space<vmem>>, vector<128x128xf32>
    tpu.vector_store %arg8[%c0_6, %c0_7], %7 {strides = array<i32>} : memref<128x128xf32, #tpu.memory_space<vmem>>, vector<128x128xf32>,
    %c0_i32_8 = arith.constant 0 : i32
    %9 = arith.cmpi eq, %arg1, %c0_i32_8 : i32
    %10 = arith.extui %9 : i1 to i32
    %c0_i32_9 = arith.constant 0 : i32
    %11 = arith.cmpi ne, %10, %c0_i32_9 : i32
    scf.if %11 {
      %c0_10 = arith.constant 0 : index
      %c0_11 = arith.constant 0 : index
      %12 = vector.load %arg8[%c0_10, %c0_11] : memref<128x128xf32, #tpu.memory_space<vmem>>, vector<128x128xf32>
      %c0_12 = arith.constant 0 : index
      %c0_13 = arith.constant 0 : index
      %13 = vector.load %arg4[%c0_12, %c0_13] : memref<1x128xf32, #tpu.memory_space<vmem>>, vector<1x128xf32>
      %14 = vector.broadcast %13 : vector<1x128xf32> to vector<128x128xf32>
      %15 = arith.mulf %12, %14 : vector<128x128xf32>
      %c0_14 = arith.constant 0 : index
      %c0_15 = arith.constant 0 : index
      %16 = vector.load %arg5[%c0_14, %c0_15] : memref<1x128xf32, #tpu.memory_space<vmem>>, vector<1x128xf32>
      %17 = vector.broadcast %16 : vector<1x128xf32> to vector<128x128xf32>
      %18 = arith.addf %15, %17 : vector<128x128xf32>
      %c0_16 = arith.constant 0 : index
      %c0_17 = arith.constant 0 : index
      %19 = vector.load %arg6[%c0_16, %c0_17] : memref<128x128xf32, #tpu.memory_space<vmem>>, vector<128x128xf32>
      %20 = arith.addf %18, %19 : vector<128x128xf32>
      %cst_18 = arith.constant 1.000000e+00 : f32
      %21 = vector.broadcast %cst_18 : f32 to vector<128x128xf32>
      %22 = arith.cmpf oge, %20, %21 : vector<128x128xf32>
      %23 = arith.extui %22 : vector<128x128xi1> to vector<128x128xi32>
      %24 = arith.sitofp %23 : vector<128x128xi32> to vector<128x128xf32>
      %c0_19 = arith.constant 0 : index
      %c0_20 = arith.constant 0 : index
      %25 = vector.load %arg7[%c0_19, %c0_20] : memref<128x128xf32, #tpu.memory_space<vmem>>, vector<128x128xf32>
      tpu.vector_store %arg7[%c0_19, %c0_20], %24 {strides = array<i32>} : memref<128x128xf32, #tpu.memory_space<vmem>>, vector<128x128xf32>,
    } else {
    }
    return
  }
  func.func @transform_0(%arg0: i32, %arg1: i32) -> (i32, i32) {
    %c0_i32 = arith.constant 0 : i32
    return %arg0, %arg1 : i32, i32
  }
  func.func @transform_1(%arg0: i32, %arg1: i32) -> (i32, i32) {
    %c0_i32 = arith.constant 0 : i32
    %c0_i32_0 = arith.constant 0 : i32
    return %arg1, %c0_i32 : i32, i32
  }
  func.func @transform_2(%arg0: i32, %arg1: i32) -> (i32, i32) {
    %c0_i32 = arith.constant 0 : i32
    %c0_i32_0 = arith.constant 0 : i32
    %c0_i32_1 = arith.constant 0 : i32
    return %c0_i32, %c0_i32_0 : i32, i32
  }
  func.func @transform_3(%arg0: i32, %arg1: i32) -> (i32, i32) {
    %c0_i32 = arith.constant 0 : i32
    %c0_i32_0 = arith.constant 0 : i32
    %c0_i32_1 = arith.constant 0 : i32
    return %c0_i32, %c0_i32_0 : i32, i32
  }
  func.func @transform_4(%arg0: i32, %arg1: i32) -> (i32, i32) {
    %c0_i32 = arith.constant 0 : i32
    %c0_i32_0 = arith.constant 0 : i32
    return %arg0, %c0_i32 : i32, i32
  }
  func.func @transform_5(%arg0: i32, %arg1: i32) -> (i32, i32) {
    %c0_i32 = arith.constant 0 : i32
    %c0_i32_0 = arith.constant 0 : i32
    return %arg0, %c0_i32 : i32, i32
  }
}

</mosaic_0001>

<bundles_post_ra>
// kernel: a_call__.2
= control target key start
LH: loop header
LB: loop body
LE: loop exit
PB: predicated region body
PF: predicated region fallthrough
CT: control target
= control target key end

     0   :  { %v857_v46 = vmov 0.0   ;;  %s1147_s1 = inlined_call_operand.vmem [shape: bf16[128,128], index: 1, kind: input, shape index: {}]   ;;  %s1148_s4 = inlined_call_operand.vmem [shape: bf16[128,128], index: 4, kind: input, shape index: {}]   ;;  %s1149_s2 = inlined_call_operand.vmem [shape: f32[1,128], index: 2, kind: input, shape index: {}]   ;;  %s1150_s3 = inlined_call_operand.vmem [shape: f32[1,128], index: 3, kind: input, shape index: {}]   ;;  %s1151_s0 = inlined_call_operand.vmem [shape: bf16[128,128], index: 0, kind: input, shape index: {}]   ;;  %s1152_s5 = inlined_call_operand.vmem [shape: f32[1,128], index: 5, kind: input, shape index: {}]   ;;  %s1153_s6 = inlined_call_operand.vmem [shape: f32[1,128], index: 6, kind: input, shape index: {}]   ;;  %s1154_s8 = inlined_call_operand.vmem [shape: f32[128,128], index: 8, kind: output, shape index: {1}]   ;;  %s1155_s7 = inlined_call_operand.vmem [shape: bf16[128,128], index: 7, kind: output, shape index: {0}]  }
   0x1   :  { %v796_v0 = vld [vmem:[%s1147_s1 + $0x38] sm:$0xff]  ;;  %v795_v2 = vld [vmem:[%s1147_s1 + $0x30] sm:$0xff]  ;;  %v794_v4 = vld [vmem:[%s1147_s1 + $0x28] sm:$0xff] }
   0x2   :  { %v804_v1 = vld [vmem:[%s1148_s4 + $0x38] sm:$0xff]  ;;  %208 = vmatpush.bf16.msra.mxu0 %v796_v0  ;;  %836 = vmatpush.bf16.msra.mxu2 %v796_v0  ;;  %v803_v3 = vld [vmem:[%s1148_s4 + $0x30] sm:$0xff]  ;;  %v802_v5 = vld [vmem:[%s1148_s4 + $0x28] sm:$0xff] }
   0x3   :  { %844 = vmatpush.bf16.msra.mxu3 %v804_v1  ;;  %369 = vmatpush.bf16.msra.mxu1 %v804_v1  ;;  %v793_v6 = vld [vmem:[%s1147_s1 + $0x20] sm:$0xff]  ;;  %v792_v8 = vld [vmem:[%s1147_s1 + $0x18] sm:$0xff]  ;;  %v791_v10 = vld [vmem:[%s1147_s1 + $0x10] sm:$0xff] }
   0x4   :  { %v801_v7 = vld [vmem:[%s1148_s4 + $0x20] sm:$0xff]  ;;  %v800_v9 = vld [vmem:[%s1148_s4 + $0x18] sm:$0xff]  ;;  %v799_v11 = vld [vmem:[%s1148_s4 + $0x10] sm:$0xff] }
   0x5   :  { %v790_v12 = vld [vmem:[%s1147_s1 + $0x8] sm:$0xff]  ;;  %v789_v14 = vld [vmem:[%s1147_s1] sm:$0xff]  ;;  %v783_v20 = vld [vmem:[%s1151_s0 + $0x10] sm:$0xff] }
   0x6   :  { %209 = vmatpush.bf16.msra.mxu0 %v795_v2  ;;  %837 = vmatpush.bf16.msra.mxu2 %v795_v2  ;;  %v798_v13 = vld [vmem:[%s1148_s4 + $0x8] sm:$0xff]  ;;  %v797_v15 = vld [vmem:[%s1148_s4] sm:$0xff]  ;;  %v787_v21 = vld [vmem:[%s1151_s0 + $0x30] sm:$0xff] }
   0x7   :  { %845 = vmatpush.bf16.msra.mxu3 %v803_v3  ;;  %370 = vmatpush.bf16.msra.mxu1 %v803_v3  ;;  %v781_v16 = vld [vmem:[%s1151_s0] sm:$0xff]  ;;  %v782_v18 = vld [vmem:[%s1151_s0 + $0x8] sm:$0xff]  ;;  %v784_v22 = vld [vmem:[%s1151_s0 + $0x18] sm:$0xff] }
   0x8   :  { %v785_v17 = vld [vmem:[%s1151_s0 + $0x20] sm:$0xff]  ;;  %v786_v19 = vld [vmem:[%s1151_s0 + $0x28] sm:$0xff]  ;;  %v788_v23 = vld [vmem:[%s1151_s0 + $0x38] sm:$0xff] }
   0x9   :  { %v978_v24 = vld [vmem:[%s1152_s5] ss:$0 sm:$0xff] }
   0xa   :  { %210 = vmatpush.bf16.msra.mxu0 %v794_v4  ;;  %838 = vmatpush.bf16.msra.mxu2 %v794_v4  ;;  %v983_v25 = vld [vmem:[%s1149_s2] ss:$0 sm:$0xff] }
   0xb   :  { %846 = vmatpush.bf16.msra.mxu3 %v802_v5  ;;  %371 = vmatpush.bf16.msra.mxu1 %v802_v5  ;;  %v988_v27 = vld [vmem:[%s1153_s6] ss:$0 sm:$0xff] }
   0xc   :  { %v995_v31 = vld [vmem:[%s1150_s3] ss:$0 sm:$0xff] }
   0xe   :  { %211 = vmatpush.bf16.msra.mxu0 %v793_v6  ;;  %839 = vmatpush.bf16.msra.mxu2 %v793_v6 }
   0xf   :  { %847 = vmatpush.bf16.msra.mxu3 %v801_v7  ;;  %372 = vmatpush.bf16.msra.mxu1 %v801_v7 }
  0x12   :  { %212 = vmatpush.bf16.msra.mxu0 %v792_v8  ;;  %840 = vmatpush.bf16.msra.mxu2 %v792_v8 }
  0x13   :  { %848 = vmatpush.bf16.msra.mxu3 %v800_v9  ;;  %373 = vmatpush.bf16.msra.mxu1 %v800_v9 }
  0x16   :  { %213 = vmatpush.bf16.msra.mxu0 %v791_v10  ;;  %841 = vmatpush.bf16.msra.mxu2 %v791_v10 }
  0x17   :  { %849 = vmatpush.bf16.msra.mxu3 %v799_v11  ;;  %374 = vmatpush.bf16.msra.mxu1 %v799_v11 }
  0x1a   :  { %214 = vmatpush.bf16.msra.mxu0 %v790_v12  ;;  %842 = vmatpush.bf16.msra.mxu2 %v790_v12 }
  0x1b   :  { %850 = vmatpush.bf16.msra.mxu3 %v798_v13  ;;  %375 = vmatpush.bf16.msra.mxu1 %v798_v13 }
  0x1e   :  { %215 = vmatpush.bf16.msra.mxu0 %v789_v14  ;;  %843 = vmatpush.bf16.msra.mxu2 %v789_v14 }
  0x1f   :  { %851 = vmatpush.bf16.msra.mxu3 %v797_v15  ;;  %376 = vmatpush.bf16.msra.mxu1 %v797_v15 }
  0x21   :  { %216 = vmatmul.bf16.vlgmr.msra.gmra.mxu0 %v781_v16  ;;  %236 = vmatmul.bf16.vlgmr.msra.gmra.mxu2 %v785_v17 }
  0x22   :  { %397 = vmatmul.bf16.vlgmr.msra.gmra.mxu3 %v785_v17  ;;  %377 = vmatmul.bf16.vlgmr.msra.gmra.mxu1 %v781_v16 }
  0x31   :  { %221 = vmatmul.bf16.gmra.mxu0 %v782_v18  ;;  %241 = vmatmul.bf16.gmra.mxu2 %v786_v19 }
  0x32   :  { %402 = vmatmul.bf16.gmra.mxu3 %v786_v19  ;;  %382 = vmatmul.bf16.gmra.mxu1 %v782_v18 }
  0x41   :  { %226 = vmatmul.bf16.gmra.mxu0 %v783_v20  ;;  %246 = vmatmul.bf16.gmra.mxu2 %v787_v21 }
  0x42   :  { %407 = vmatmul.bf16.gmra.mxu3 %v787_v21  ;;  %387 = vmatmul.bf16.gmra.mxu1 %v783_v20 }
  0x51   :  { %231 = vmatmul.bf16.gmra.mxu0 %v784_v22  ;;  %251 = vmatmul.bf16.gmra.mxu2 %v788_v23 }
  0x52   :  { %412 = vmatmul.bf16.gmra.mxu3 %v788_v23  ;;  %392 = vmatmul.bf16.gmra.mxu1 %v784_v22 }
  0x9e   :  { %v217_v26 = vpop.f32.mrf.mxu0 }
  0x9f   :  { %v378_v28 = vpop.f32.mrf.mxu1  ;;  %v473_v30 = vmul.f32 %v983_v25, %v217_v26 }
  0xa0   :  { %v609_v29 = vmul.f32 %v978_v24, %v378_v28 }
  0xa1   :  { %v493_v34 = vadd.f32 %v995_v31, %v473_v30 }
  0xa2   :  { %v629_v32 = vadd.f32 %v988_v27, %v609_v29 }
  0xa3   :  { %vm509_vm0 = vcmp.ge.f32.partialorder %v493_v34, 1.0 }
  0xa4   :  { %645 = vst [vmem:[%s1154_s8] sm:$0xff] %v629_v32  ;;  %v237_v33 = vpop.f32.mrf.mxu2  ;;  %v765_v47 = vsel %vm509_vm0, 1.0, %v857_v46 }
  0xa5   :  { %v398_v35 = vpop.f32.mrf.mxu3  ;;  %v481_v38 = vmul.f32 %v983_v25, %v237_v33 }
  0xa6   :  { %v617_v36 = vmul.f32 %v978_v24, %v398_v35  ;;  %v219_v37 = vpop.f32.mrf.mxu0 }
  0xa7   :  { %v474_v39 = vmul.f32 %v983_v25, %v219_v37  ;;  %v380_v40 = vpop.f32.mrf.mxu1  ;;  %v501_v45 = vadd.f32 %v995_v31, %v481_v38 }
  0xa8   :  { %v637_v41 = vadd.f32 %v988_v27, %v617_v36  ;;  %v610_v42 = vmul.f32 %v978_v24, %v380_v40 }
  0xa9   :  { %v494_v43 = vadd.f32 %v995_v31, %v474_v39  ;;  %vm517_vm2 = vcmp.ge.f32.partialorder %v501_v45, 1.0 }
  0xaa   :  { %653 = vst [vmem:[%s1154_s8 + $0x40] sm:$0xff] %v637_v41  ;;  %v630_v44 = vadd.f32 %v988_v27, %v610_v42  ;;  %v773_v60 = vsel %vm517_vm2, 1.0, %v857_v46 }
  0xab   :  { %vm510_vm1 = vcmp.ge.f32.partialorder %v494_v43, 1.0 }
  0xac   :  { %v766_v48 = vsel %vm510_vm1, 1.0, %v857_v46  ;;  %646 = vst [vmem:[%s1154_s8 + $0x8] sm:$0xff] %v630_v44  ;;  %v239_v49 = vpop.f32.mrf.mxu2 }
  0xad   :  { %v806_v50 = vpack.c.bf16 %v766_v48, %v765_v47  ;;  %v482_v51 = vmul.f32 %v983_v25, %v239_v49  ;;  %v400_v52 = vpop.f32.mrf.mxu3 }
  0xae   :  { %v618_v53 = vmul.f32 %v978_v24, %v400_v52  ;;  %v222_v54 = vpop.f32.mrf.mxu0 }
  0xaf   :  { %807 = vst [vmem:[%s1155_s7] sm:$0xff] %v806_v50   ;;  %v502_v55 = vadd.f32 %v995_v31, %v482_v51  ;;  %v383_v56 = vpop.f32.mrf.mxu1  ;;  %v475_v59 = vmul.f32 %v983_v25, %v222_v54 }
  0xb0   :  { %v638_v57 = vadd.f32 %v988_v27, %v618_v53  ;;  %v611_v58 = vmul.f32 %v978_v24, %v383_v56 }
  0xb1   :  { %vm518_vm3 = vcmp.ge.f32.partialorder %v502_v55, 1.0  ;;  %v495_v1 = vadd.f32 %v995_v31, %v475_v59 }
  0xb2   :  { %v774_v61 = vsel %vm518_vm3, 1.0, %v857_v46  ;;  %654 = vst [vmem:[%s1154_s8 + $0x48] sm:$0xff] %v638_v57  ;;  %v631_v62 = vadd.f32 %v988_v27, %v611_v58 }
  0xb3   :  { %v818_v63 = vpack.c.bf16 %v774_v61, %v773_v60  ;;  %vm511_vm4 = vcmp.ge.f32.partialorder %v495_v1, 1.0 }
  0xb4   :  { %647 = vst [vmem:[%s1154_s8 + $0x10] sm:$0xff] %v631_v62  ;;  %v242_v0 = vpop.f32.mrf.mxu2  ;;  %v767_v13 = vsel %vm511_vm4, 1.0, %v857_v46 }
  0xb5   :  { %832 = vst [vmem:[%s1155_s7 + $0x20] sm:$0xff] %v818_v63   ;;  %v403_v2 = vpop.f32.mrf.mxu3  ;;  %v483_v5 = vmul.f32 %v983_v25, %v242_v0 }
  0xb6   :  { %v619_v3 = vmul.f32 %v978_v24, %v403_v2  ;;  %v224_v4 = vpop.f32.mrf.mxu0 }
  0xb7   :  { %v476_v6 = vmul.f32 %v983_v25, %v224_v4  ;;  %v385_v7 = vpop.f32.mrf.mxu1  ;;  %v503_v12 = vadd.f32 %v995_v31, %v483_v5 }
  0xb8   :  { %v639_v8 = vadd.f32 %v988_v27, %v619_v3  ;;  %v612_v9 = vmul.f32 %v978_v24, %v385_v7 }
  0xb9   :  { %v496_v10 = vadd.f32 %v995_v31, %v476_v6  ;;  %vm519_vm6 = vcmp.ge.f32.partialorder %v503_v12, 1.0 }
  0xba   :  { %655 = vst [vmem:[%s1154_s8 + $0x50] sm:$0xff] %v639_v8  ;;  %v632_v11 = vadd.f32 %v988_v27, %v612_v9  ;;  %v775_v29 = vsel %vm519_vm6, 1.0, %v857_v46 }
  0xbb   :  { %vm512_vm5 = vcmp.ge.f32.partialorder %v496_v10, 1.0 }
  0xbc   :  { %v768_v14 = vsel %vm512_vm5, 1.0, %v857_v46  ;;  %648 = vst [vmem:[%s1154_s8 + $0x18] sm:$0xff] %v632_v11  ;;  %v244_v15 = vpop.f32.mrf.mxu2 }
  0xbd   :  { %v809_v16 = vpack.c.bf16 %v768_v14, %v767_v13  ;;  %v484_v17 = vmul.f32 %v983_v25, %v244_v15  ;;  %v405_v18 = vpop.f32.mrf.mxu3 }
  0xbe   :  { %v620_v19 = vmul.f32 %v978_v24, %v405_v18  ;;  %v227_v20 = vpop.f32.mrf.mxu0 }
  0xbf   :  { %829 = vst [vmem:[%s1155_s7 + $0x8] sm:$0xff] %v809_v16   ;;  %v504_v21 = vadd.f32 %v995_v31, %v484_v17  ;;  %v388_v22 = vpop.f32.mrf.mxu1  ;;  %v477_v28 = vmul.f32 %v983_v25, %v227_v20 }
  0xc0   :  { %v640_v23 = vadd.f32 %v988_v27, %v620_v19  ;;  %v613_v26 = vmul.f32 %v978_v24, %v388_v22 }
  0xc1   :  { %vm520_vm7 = vcmp.ge.f32.partialorder %v504_v21, 1.0  ;;  %v497_v35 = vadd.f32 %v995_v31, %v477_v28 }
  0xc2   :  { %v776_v30 = vsel %vm520_vm7, 1.0, %v857_v46  ;;  %656 = vst [vmem:[%s1154_s8 + $0x58] sm:$0xff] %v640_v23  ;;  %v633_v32 = vadd.f32 %v988_v27, %v613_v26 }
  0xc3   :  { %v821_v33 = vpack.c.bf16 %v776_v30, %v775_v29  ;;  %vm513_vm8 = vcmp.ge.f32.partialorder %v497_v35, 1.0 }
  0xc4   :  { %649 = vst [vmem:[%s1154_s8 + $0x20] sm:$0xff] %v633_v32  ;;  %v247_v34 = vpop.f32.mrf.mxu2  ;;  %v769_v48 = vsel %vm513_vm8, 1.0, %v857_v46 }
  0xc5   :  { %833 = vst [vmem:[%s1155_s7 + $0x28] sm:$0xff] %v821_v33   ;;  %v408_v36 = vpop.f32.mrf.mxu3  ;;  %v485_v39 = vmul.f32 %v983_v25, %v247_v34 }
  0xc6   :  { %v621_v37 = vmul.f32 %v978_v24, %v408_v36  ;;  %v229_v38 = vpop.f32.mrf.mxu0 }
  0xc7   :  { %v478_v40 = vmul.f32 %v983_v25, %v229_v38  ;;  %v390_v41 = vpop.f32.mrf.mxu1  ;;  %v505_v47 = vadd.f32 %v995_v31, %v485_v39 }
  0xc8   :  { %v641_v42 = vadd.f32 %v988_v27, %v621_v37  ;;  %v614_v43 = vmul.f32 %v978_v24, %v390_v41 }
  0xc9   :  { %v498_v44 = vadd.f32 %v995_v31, %v478_v40  ;;  %vm521_vm10 = vcmp.ge.f32.partialorder %v505_v47, 1.0 }
  0xca   :  { %657 = vst [vmem:[%s1154_s8 + $0x60] sm:$0xff] %v641_v42  ;;  %v634_v45 = vadd.f32 %v988_v27, %v614_v43  ;;  %v777_v61 = vsel %vm521_vm10, 1.0, %v857_v46 }
  0xcb   :  { %vm514_vm9 = vcmp.ge.f32.partialorder %v498_v44, 1.0 }
  0xcc   :  { %v770_v49 = vsel %vm514_vm9, 1.0, %v857_v46  ;;  %650 = vst [vmem:[%s1154_s8 + $0x28] sm:$0xff] %v634_v45  ;;  %v249_v50 = vpop.f32.mrf.mxu2 }
  0xcd   :  { %v812_v51 = vpack.c.bf16 %v770_v49, %v769_v48  ;;  %v486_v52 = vmul.f32 %v983_v25, %v249_v50  ;;  %v410_v53 = vpop.f32.mrf.mxu3 }
  0xce   :  { %v622_v54 = vmul.f32 %v978_v24, %v410_v53  ;;  %v232_v55 = vpop.f32.mrf.mxu0 }
  0xcf   :  { %830 = vst [vmem:[%s1155_s7 + $0x10] sm:$0xff] %v812_v51   ;;  %v506_v56 = vadd.f32 %v995_v31, %v486_v52  ;;  %v393_v57 = vpop.f32.mrf.mxu1  ;;  %v479_v60 = vmul.f32 %v983_v25, %v232_v55 }
  0xd0   :  { %v642_v58 = vadd.f32 %v988_v27, %v622_v54  ;;  %v615_v59 = vmul.f32 %v978_v24, %v393_v57 }
  0xd1   :  { %vm522_vm11 = vcmp.ge.f32.partialorder %v506_v56, 1.0  ;;  %v499_v2 = vadd.f32 %v995_v31, %v479_v60 }
  0xd2   :  { %v778_v62 = vsel %vm522_vm11, 1.0, %v857_v46  ;;  %658 = vst [vmem:[%s1154_s8 + $0x68] sm:$0xff] %v642_v58  ;;  %v635_v63 = vadd.f32 %v988_v27, %v615_v59 }
  0xd3   :  { %v824_v0 = vpack.c.bf16 %v778_v62, %v777_v61  ;;  %vm515_vm12 = vcmp.ge.f32.partialorder %v499_v2, 1.0 }
  0xd4   :  { %651 = vst [vmem:[%s1154_s8 + $0x30] sm:$0xff] %v635_v63  ;;  %v252_v1 = vpop.f32.mrf.mxu2  ;;  %v771_v14 = vsel %vm515_vm12, 1.0, %v857_v46 }
  0xd5   :  { %834 = vst [vmem:[%s1155_s7 + $0x30] sm:$0xff] %v824_v0   ;;  %v413_v3 = vpop.f32.mrf.mxu3  ;;  %v487_v6 = vmul.f32 %v983_v25, %v252_v1 }
  0xd6   :  { %v623_v4 = vmul.f32 %v978_v24, %v413_v3  ;;  %v234_v5 = vpop.f32.mrf.mxu0 }
  0xd7   :  { %v480_v7 = vmul.f32 %v983_v25, %v234_v5  ;;  %v395_v8 = vpop.f32.mrf.mxu1  ;;  %v507_v13 = vadd.f32 %v995_v31, %v487_v6 }
  0xd8   :  { %v643_v9 = vadd.f32 %v988_v27, %v623_v4  ;;  %v616_v10 = vmul.f32 %v978_v24, %v395_v8 }
  0xd9   :  { %v500_v11 = vadd.f32 %v995_v31, %v480_v7  ;;  %vm523_vm14 = vcmp.ge.f32.partialorder %v507_v13, 1.0 }
  0xda   :  { %659 = vst [vmem:[%s1154_s8 + $0x70] sm:$0xff] %v643_v9  ;;  %v636_v12 = vadd.f32 %v988_v27, %v616_v10  ;;  %v779_v23 = vsel %vm523_vm14, 1.0, %v857_v46 }
  0xdb   :  { %vm516_vm13 = vcmp.ge.f32.partialorder %v500_v11, 1.0 }
  0xdc   :  { %v772_v15 = vsel %vm516_vm13, 1.0, %v857_v46  ;;  %652 = vst [vmem:[%s1154_s8 + $0x38] sm:$0xff] %v636_v12  ;;  %v254_v16 = vpop.f32.mrf.mxu2 }
  0xdd   :  { %v815_v17 = vpack.c.bf16 %v772_v15, %v771_v14  ;;  %v488_v18 = vmul.f32 %v983_v25, %v254_v16  ;;  %v415_v19 = vpop.f32.mrf.mxu3 }
  0xde   :  { %v624_v20 = vmul.f32 %v978_v24, %v415_v19 }
  0xdf   :  { %831 = vst [vmem:[%s1155_s7 + $0x18] sm:$0xff] %v815_v17   ;;  %v508_v21 = vadd.f32 %v995_v31, %v488_v18 }
  0xe0   :  { %v644_v22 = vadd.f32 %v988_v27, %v624_v20 }
  0xe1   :  { %vm524_vm15 = vcmp.ge.f32.partialorder %v508_v21, 1.0 }
  0xe2   :  { %v780_v26 = vsel %vm524_vm15, 1.0, %v857_v46  ;;  %660 = vst [vmem:[%s1154_s8 + $0x78] sm:$0xff] %v644_v22 }
  0xe3   :  { %v827_v25 = vpack.c.bf16 %v780_v26, %v779_v23 }
  0xe5   :  { %835 = vst [vmem:[%s1155_s7 + $0x38] sm:$0xff] %v827_v25  }

// kernel: a_call__.3
= control target key start
LH: loop header
LB: loop body
LE: loop exit
PB: predicated region body
PF: predicated region fallthrough
CT: control target
= control target key end

     0   :  { %v547_v30 = vmov 0.0   ;;  %s780_s1 = inlined_call_operand.vmem [shape: bf16[128,128], index: 1, kind: input, shape index: {}]   ;;  %s781_s2 = inlined_call_operand.vmem [shape: f32[1,128], index: 2, kind: input, shape index: {}]   ;;  %s782_s3 = inlined_call_operand.vmem [shape: f32[1,128], index: 3, kind: input, shape index: {}]   ;;  %s783_s0 = inlined_call_operand.vmem [shape: bf16[128,128], index: 0, kind: input, shape index: {}]   ;;  %s784_s4 = inlined_call_operand.vmem [shape: f32[128,128], index: 4, kind: input, shape index: {}]   ;;  %s785_s5 = inlined_call_operand.vmem [shape: f32[128,128], index: 5, kind: output, shape index: {}]  }
   0x1   :  { %v519_v0 = vld [vmem:[%s780_s1 + $0x38] sm:$0xff]  ;;  %v518_v1 = vld [vmem:[%s780_s1 + $0x30] sm:$0xff]  ;;  %v517_v2 = vld [vmem:[%s780_s1 + $0x28] sm:$0xff] }
   0x2   :  { %184 = vmatpush.bf16.msra.mxu0 %v519_v0  ;;  %520 = vmatpush.bf16.msra.mxu1 %v519_v0  ;;  %v516_v3 = vld [vmem:[%s780_s1 + $0x20] sm:$0xff]  ;;  %v515_v4 = vld [vmem:[%s780_s1 + $0x18] sm:$0xff]  ;;  %v514_v5 = vld [vmem:[%s780_s1 + $0x10] sm:$0xff] }
   0x3   :  { %521 = vmatpush.bf16.msra.mxu2 %v519_v0  ;;  %522 = vmatpush.bf16.msra.mxu3 %v519_v0  ;;  %v513_v6 = vld [vmem:[%s780_s1 + $0x8] sm:$0xff]  ;;  %v512_v7 = vld [vmem:[%s780_s1] sm:$0xff]  ;;  %v506_v9 = vld [vmem:[%s783_s0 + $0x10] sm:$0xff] }
   0x4   :  { %v504_v8 = vld [vmem:[%s783_s0] sm:$0xff]  ;;  %v510_v11 = vld [vmem:[%s783_s0 + $0x30] sm:$0xff]  ;;  %v505_v12 = vld [vmem:[%s783_s0 + $0x8] sm:$0xff] }
   0x5   :  { %v508_v10 = vld [vmem:[%s783_s0 + $0x20] sm:$0xff]  ;;  %v507_v13 = vld [vmem:[%s783_s0 + $0x18] sm:$0xff]  ;;  %v509_v14 = vld [vmem:[%s783_s0 + $0x28] sm:$0xff] }
   0x6   :  { %185 = vmatpush.bf16.msra.mxu0 %v518_v1  ;;  %523 = vmatpush.bf16.msra.mxu1 %v518_v1  ;;  %v511_v15 = vld [vmem:[%s783_s0 + $0x38] sm:$0xff]  ;;  %v629_v16 = vld [vmem:[%s781_s2] ss:$0 sm:$0xff]  ;;  %v325_v43 = vld [vmem:[%s784_s4 + $0x8] sm:$0xff] }
   0x7   :  { %524 = vmatpush.bf16.msra.mxu2 %v518_v1  ;;  %525 = vmatpush.bf16.msra.mxu3 %v518_v1  ;;  %v634_v17 = vld [vmem:[%s782_s3] ss:$0 sm:$0xff]  ;;  %v329_v44 = vld [vmem:[%s784_s4 + $0x28] sm:$0xff] }
   0x8   :  { %v324_v22 = vld [vmem:[%s784_s4] sm:$0xff]  ;;  %v333_v61 = vld [vmem:[%s784_s4 + $0x48] sm:$0xff] }
   0x9   :  { %v328_v23 = vld [vmem:[%s784_s4 + $0x20] sm:$0xff]  ;;  %v337_v62 = vld [vmem:[%s784_s4 + $0x68] sm:$0xff] }
   0xa   :  { %186 = vmatpush.bf16.msra.mxu0 %v517_v2  ;;  %526 = vmatpush.bf16.msra.mxu1 %v517_v2  ;;  %v332_v37 = vld [vmem:[%s784_s4 + $0x40] sm:$0xff] }
   0xb   :  { %527 = vmatpush.bf16.msra.mxu2 %v517_v2  ;;  %528 = vmatpush.bf16.msra.mxu3 %v517_v2  ;;  %v336_v38 = vld [vmem:[%s784_s4 + $0x60] sm:$0xff] }
   0xe   :  { %187 = vmatpush.bf16.msra.mxu0 %v516_v3  ;;  %529 = vmatpush.bf16.msra.mxu1 %v516_v3 }
   0xf   :  { %530 = vmatpush.bf16.msra.mxu2 %v516_v3  ;;  %531 = vmatpush.bf16.msra.mxu3 %v516_v3  ;;  %v326_v3 = vld [vmem:[%s784_s4 + $0x10] sm:$0xff] }
  0x12   :  { %188 = vmatpush.bf16.msra.mxu0 %v515_v4  ;;  %532 = vmatpush.bf16.msra.mxu1 %v515_v4 }
  0x13   :  { %533 = vmatpush.bf16.msra.mxu2 %v515_v4  ;;  %534 = vmatpush.bf16.msra.mxu3 %v515_v4  ;;  %v330_v4 = vld [vmem:[%s784_s4 + $0x30] sm:$0xff] }
  0x16   :  { %189 = vmatpush.bf16.msra.mxu0 %v514_v5  ;;  %535 = vmatpush.bf16.msra.mxu1 %v514_v5 }
  0x17   :  { %536 = vmatpush.bf16.msra.mxu2 %v514_v5  ;;  %537 = vmatpush.bf16.msra.mxu3 %v514_v5 }
  0x1a   :  { %190 = vmatpush.bf16.msra.mxu0 %v513_v6  ;;  %538 = vmatpush.bf16.msra.mxu1 %v513_v6 }
  0x1b   :  { %539 = vmatpush.bf16.msra.mxu2 %v513_v6  ;;  %540 = vmatpush.bf16.msra.mxu3 %v513_v6 }
  0x1e   :  { %191 = vmatpush.bf16.msra.mxu0 %v512_v7  ;;  %541 = vmatpush.bf16.msra.mxu1 %v512_v7 }
  0x1f   :  { %542 = vmatpush.bf16.msra.mxu2 %v512_v7  ;;  %543 = vmatpush.bf16.msra.mxu3 %v512_v7 }
  0x21   :  { %192 = vmatmul.bf16.vlgmr.msra.gmra.mxu0 %v504_v8  ;;  %202 = vmatmul.bf16.vlgmr.msra.gmra.mxu1 %v506_v9 }
  0x22   :  { %212 = vmatmul.bf16.vlgmr.msra.gmra.mxu2 %v508_v10  ;;  %222 = vmatmul.bf16.vlgmr.msra.gmra.mxu3 %v510_v11 }
  0x31   :  { %197 = vmatmul.bf16.gmra.mxu0 %v505_v12  ;;  %207 = vmatmul.bf16.gmra.mxu1 %v507_v13 }
  0x32   :  { %217 = vmatmul.bf16.gmra.mxu2 %v509_v14  ;;  %227 = vmatmul.bf16.gmra.mxu3 %v511_v15 }
  0x9e   :  { %v193_v18 = vpop.f32.mrf.mxu0  ;;  %v203_v19 = vpop.f32.mrf.mxu1 }
  0x9f   :  { %v288_v20 = vmul.f32 %v629_v16, %v193_v18  ;;  %v292_v21 = vmul.f32 %v629_v16, %v203_v19 }
  0xa1   :  { %v308_v24 = vadd.f32 %v634_v17, %v288_v20  ;;  %v312_v25 = vadd.f32 %v634_v17, %v292_v21 }
  0xa3   :  { %v340_v26 = vadd.f32 %v324_v22, %v308_v24  ;;  %v344_v27 = vadd.f32 %v328_v23, %v312_v25  ;;  %v334_v23 = vld [vmem:[%s784_s4 + $0x50] sm:$0xff] }
  0xa4   :  { %v338_v24 = vld [vmem:[%s784_s4 + $0x70] sm:$0xff] }
  0xa5   :  { %vm356_vm0 = vcmp.ge.f32.partialorder %v340_v26, 1.0  ;;  %vm360_vm1 = vcmp.ge.f32.partialorder %v344_v27, 1.0  ;;  %v213_v28 = vpop.f32.mrf.mxu2  ;;  %v223_v29 = vpop.f32.mrf.mxu3 }
  0xa6   :  { %v488_v31 = vsel %vm356_vm0, 1.0, %v547_v30  ;;  %v492_v32 = vsel %vm360_vm1, 1.0, %v547_v30  ;;  %v296_v33 = vmul.f32 %v629_v16, %v213_v28  ;;  %v300_v34 = vmul.f32 %v629_v16, %v223_v29  ;;  %v195_v35 = vpop.f32.mrf.mxu0  ;;  %v205_v36 = vpop.f32.mrf.mxu1  ;;  %v327_v29 = vld [vmem:[%s784_s4 + $0x18] sm:$0xff] }
  0xa7   :  { %404 = vst [vmem:[%s785_s5] sm:$0xff] %v488_v31  ;;  %v289_v39 = vmul.f32 %v629_v16, %v195_v35  ;;  %v293_v40 = vmul.f32 %v629_v16, %v205_v36  ;;  %v331_v31 = vld [vmem:[%s784_s4 + $0x38] sm:$0xff] }
  0xa8   :  { %408 = vst [vmem:[%s785_s5 + $0x20] sm:$0xff] %v492_v32  ;;  %v316_v41 = vadd.f32 %v634_v17, %v296_v33  ;;  %v320_v42 = vadd.f32 %v634_v17, %v300_v34 }
  0xa9   :  { %v309_v45 = vadd.f32 %v634_v17, %v289_v39  ;;  %v313_v46 = vadd.f32 %v634_v17, %v293_v40 }
  0xaa   :  { %v348_v47 = vadd.f32 %v332_v37, %v316_v41  ;;  %v352_v48 = vadd.f32 %v336_v38, %v320_v42 }
  0xab   :  { %v341_v49 = vadd.f32 %v325_v43, %v309_v45  ;;  %v345_v50 = vadd.f32 %v329_v44, %v313_v46  ;;  %v335_v46 = vld [vmem:[%s784_s4 + $0x58] sm:$0xff] }
  0xac   :  { %vm364_vm2 = vcmp.ge.f32.partialorder %v348_v47, 1.0  ;;  %vm368_vm3 = vcmp.ge.f32.partialorder %v352_v48, 1.0  ;;  %v339_v47 = vld [vmem:[%s784_s4 + $0x78] sm:$0xff] }
  0xad   :  { %v496_v51 = vsel %vm364_vm2, 1.0, %v547_v30  ;;  %v500_v52 = vsel %vm368_vm3, 1.0, %v547_v30  ;;  %vm357_vm4 = vcmp.ge.f32.partialorder %v341_v49, 1.0  ;;  %vm361_vm5 = vcmp.ge.f32.partialorder %v345_v50, 1.0  ;;  %v215_v53 = vpop.f32.mrf.mxu2  ;;  %v225_v54 = vpop.f32.mrf.mxu3 }
  0xae   :  { %412 = vst [vmem:[%s785_s5 + $0x40] sm:$0xff] %v496_v51  ;;  %v489_v55 = vsel %vm357_vm4, 1.0, %v547_v30  ;;  %v493_v56 = vsel %vm361_vm5, 1.0, %v547_v30  ;;  %v297_v57 = vmul.f32 %v629_v16, %v215_v53  ;;  %v301_v58 = vmul.f32 %v629_v16, %v225_v54  ;;  %v198_v59 = vpop.f32.mrf.mxu0  ;;  %v208_v60 = vpop.f32.mrf.mxu1 }
  0xaf   :  { %416 = vst [vmem:[%s785_s5 + $0x60] sm:$0xff] %v500_v52  ;;  %v290_v63 = vmul.f32 %v629_v16, %v198_v59  ;;  %v294_v0 = vmul.f32 %v629_v16, %v208_v60 }
  0xb0   :  { %405 = vst [vmem:[%s785_s5 + $0x8] sm:$0xff] %v489_v55  ;;  %v317_v1 = vadd.f32 %v634_v17, %v297_v57  ;;  %v321_v2 = vadd.f32 %v634_v17, %v301_v58 }
  0xb1   :  { %409 = vst [vmem:[%s785_s5 + $0x28] sm:$0xff] %v493_v56  ;;  %v310_v5 = vadd.f32 %v634_v17, %v290_v63  ;;  %v314_v6 = vadd.f32 %v634_v17, %v294_v0 }
  0xb2   :  { %v349_v7 = vadd.f32 %v333_v61, %v317_v1  ;;  %v353_v8 = vadd.f32 %v337_v62, %v321_v2 }
  0xb3   :  { %v342_v9 = vadd.f32 %v326_v3, %v310_v5  ;;  %v346_v10 = vadd.f32 %v330_v4, %v314_v6 }
  0xb4   :  { %vm365_vm6 = vcmp.ge.f32.partialorder %v349_v7, 1.0  ;;  %vm369_vm7 = vcmp.ge.f32.partialorder %v353_v8, 1.0 }
  0xb5   :  { %v497_v11 = vsel %vm365_vm6, 1.0, %v547_v30  ;;  %v501_v12 = vsel %vm369_vm7, 1.0, %v547_v30  ;;  %vm358_vm8 = vcmp.ge.f32.partialorder %v342_v9, 1.0  ;;  %vm362_vm9 = vcmp.ge.f32.partialorder %v346_v10, 1.0  ;;  %v218_v13 = vpop.f32.mrf.mxu2  ;;  %v228_v14 = vpop.f32.mrf.mxu3 }
  0xb6   :  { %413 = vst [vmem:[%s785_s5 + $0x48] sm:$0xff] %v497_v11  ;;  %v490_v15 = vsel %vm358_vm8, 1.0, %v547_v30  ;;  %v494_v18 = vsel %vm362_vm9, 1.0, %v547_v30  ;;  %v298_v19 = vmul.f32 %v629_v16, %v218_v13  ;;  %v302_v20 = vmul.f32 %v629_v16, %v228_v14  ;;  %v200_v21 = vpop.f32.mrf.mxu0  ;;  %v210_v22 = vpop.f32.mrf.mxu1 }
  0xb7   :  { %417 = vst [vmem:[%s785_s5 + $0x68] sm:$0xff] %v501_v12  ;;  %v291_v25 = vmul.f32 %v629_v16, %v200_v21  ;;  %v295_v26 = vmul.f32 %v629_v16, %v210_v22 }
  0xb8   :  { %406 = vst [vmem:[%s785_s5 + $0x10] sm:$0xff] %v490_v15  ;;  %v318_v27 = vadd.f32 %v634_v17, %v298_v19  ;;  %v322_v28 = vadd.f32 %v634_v17, %v302_v20 }
  0xb9   :  { %410 = vst [vmem:[%s785_s5 + $0x30] sm:$0xff] %v494_v18  ;;  %v311_v32 = vadd.f32 %v634_v17, %v291_v25  ;;  %v315_v33 = vadd.f32 %v634_v17, %v295_v26 }
  0xba   :  { %v350_v34 = vadd.f32 %v334_v23, %v318_v27  ;;  %v354_v35 = vadd.f32 %v338_v24, %v322_v28 }
  0xbb   :  { %v343_v36 = vadd.f32 %v327_v29, %v311_v32  ;;  %v347_v37 = vadd.f32 %v331_v31, %v315_v33 }
  0xbc   :  { %vm366_vm10 = vcmp.ge.f32.partialorder %v350_v34, 1.0  ;;  %vm370_vm11 = vcmp.ge.f32.partialorder %v354_v35, 1.0 }
  0xbd   :  { %v498_v38 = vsel %vm366_vm10, 1.0, %v547_v30  ;;  %v502_v39 = vsel %vm370_vm11, 1.0, %v547_v30  ;;  %vm359_vm12 = vcmp.ge.f32.partialorder %v343_v36, 1.0  ;;  %vm363_vm13 = vcmp.ge.f32.partialorder %v347_v37, 1.0  ;;  %v220_v40 = vpop.f32.mrf.mxu2  ;;  %v230_v41 = vpop.f32.mrf.mxu3 }
  0xbe   :  { %414 = vst [vmem:[%s785_s5 + $0x50] sm:$0xff] %v498_v38  ;;  %v491_v42 = vsel %vm359_vm12, 1.0, %v547_v30  ;;  %v495_v43 = vsel %vm363_vm13, 1.0, %v547_v30  ;;  %v299_v44 = vmul.f32 %v629_v16, %v220_v40  ;;  %v303_v45 = vmul.f32 %v629_v16, %v230_v41 }
  0xbf   :  { %418 = vst [vmem:[%s785_s5 + $0x70] sm:$0xff] %v502_v39 }
  0xc0   :  { %407 = vst [vmem:[%s785_s5 + $0x18] sm:$0xff] %v491_v42  ;;  %v319_v48 = vadd.f32 %v634_v17, %v299_v44  ;;  %v323_v16 = vadd.f32 %v634_v17, %v303_v45 }
  0xc1   :  { %411 = vst [vmem:[%s785_s5 + $0x38] sm:$0xff] %v495_v43 }
  0xc2   :  { %v351_v49 = vadd.f32 %v335_v46, %v319_v48  ;;  %v355_v50 = vadd.f32 %v339_v47, %v323_v16 }
  0xc4   :  { %vm367_vm14 = vcmp.ge.f32.partialorder %v351_v49, 1.0  ;;  %vm371_vm15 = vcmp.ge.f32.partialorder %v355_v50, 1.0 }
  0xc5   :  { %v499_v51 = vsel %vm367_vm14, 1.0, %v547_v30  ;;  %v503_v52 = vsel %vm371_vm15, 1.0, %v547_v30 }
  0xc6   :  { %415 = vst [vmem:[%s785_s5 + $0x58] sm:$0xff] %v499_v51 }
  0xc7   :  { %419 = vst [vmem:[%s785_s5 + $0x78] sm:$0xff] %v503_v52 }

</bundles_post_ra>
